<compile_context>
chip_gen: v5e
topology: v5e:2x2
jax: 0.10.0
libtpu: 0.0.40
codegen_flags: <defaults>
</compile_context>

<pallas_src>
import functools

import jax
import jax.numpy as jnp
from jax import lax
from jax.experimental import pallas as pl
from jax.experimental.pallas import tpu as pltpu

LANES = 128                       # vreg lane width
SUBLANES = 8                      # vreg sublanes
GROUP_ELEMS = SUBLANES * LANES    # 1024 elements per (8,128) group

MAX_TILE_GROUPS = 512             # 512 groups = 4096 rows = 2 MiB f32 per input per step
MIN_PIPELINE_STEPS = 4            # adapt tile size so mid-size inputs still pipeline
SINGLE_BLOCK_MAX_GROUPS = 64      # <= 256 KiB/input: one un-pipelined step is fine
VMEM_LIMIT_BYTES = 32 * 1024 * 1024


def _cdiv(a, b):
    return -(-a // b)


def _xsigmoid_term(y, yp):
    """Elementwise xsigmoid term in f32:  e*tanh(e/2) == 2e/(1+exp(-e)) - e."""
    e = y.astype(jnp.float32) - yp.astype(jnp.float32)
    return e * jnp.tanh(0.5 * e)


# --------------------- tiny inputs: one block, one invocation ----------------------
def _xsigmoid_single_kernel(y_ref, yp_ref, out_ref):
    # Lane-dense (8,128) partial sums; the tiny final reduce happens in the wrapper.
    out_ref[...] = jnp.sum(_xsigmoid_term(y_ref[...], yp_ref[...]), axis=0)


# ------------------- large inputs: pipelined partial-sum reduction -----------------
def _xsigmoid_partial_sum_kernel(y_ref, yp_ref, out_ref, *,
                                 tile_groups, last_valid_groups):
    # out_ref: (8,128) f32 block, resident across the whole reduction axis
    # (its index_map returns the same block every step) -> accumulate in place.
    step = pl.program_id(0)

    @pl.when(step == 0)
    def _():
        out_ref[...] = jnp.zeros_like(out_ref)

    val = _xsigmoid_term(y_ref[...], yp_ref[...])        # (tile_groups, 8, 128)

    if last_valid_groups != tile_groups:
        # Only generated when the last tile is partial: zero out the padded
        # (out-of-bounds / garbage) groups of the final grid step.
        is_last = step == pl.num_programs(0) - 1
        limit = jnp.where(is_last, last_valid_groups, tile_groups)
        gidx = lax.broadcasted_iota(jnp.int32, val.shape, 0)
        val = jnp.where(gidx < limit, val, 0.0)

    # Leading-axis reduce -> pure VPU adds into the (8,128) accumulator.
    out_ref[...] += jnp.sum(val, axis=0)


@jax.jit
def xsigmoid_loss(y_t, y_prime_t):
    assert y_t.shape == y_prime_t.shape
    n = y_t.size
    y = y_t.reshape(-1)
    yp = y_prime_t.reshape(-1)

    groups_total = n // GROUP_ELEMS
    bulk = groups_total * GROUP_ELEMS

    if groups_total == 0:
        # Fewer than 1024 elements: not worth a kernel launch.
        return jnp.sum(_xsigmoid_term(y, yp)) / jnp.float32(n)

    # Lane-dense (groups, 8, 128) view of the bulk of the data (f32: matches the
    # native (8,128) tile; bf16 inputs would prefer a 16-sublane second-minor dim).
    y3 = y[:bulk].reshape(groups_total, SUBLANES, LANES)
    yp3 = yp[:bulk].reshape(groups_total, SUBLANES, LANES)

    if groups_total <= SINGLE_BLOCK_MAX_GROUPS:
        # ---------------- tiny path: whole thing in one VMEM block ----------------
        partials = pl.pallas_call(
            _xsigmoid_single_kernel,
            out_shape=jax.ShapeDtypeStruct((SUBLANES, LANES), jnp.float32),
        )(y3, yp3)
    else:
        # ---------------- pipelined path: 1-D reduction grid ----------------
        tile_groups = min(MAX_TILE_GROUPS, _cdiv(groups_total, MIN_PIPELINE_STEPS))
        num_steps = _cdiv(groups_total, tile_groups)
        last_valid = groups_total - (num_steps - 1) * tile_groups

        partials = pl.pallas_call(
            functools.partial(_xsigmoid_partial_sum_kernel,
                              tile_groups=tile_groups,
                              last_valid_groups=last_valid),
            out_shape=jax.ShapeDtypeStruct((SUBLANES, LANES), jnp.float32),
            grid_spec=pltpu.PrefetchScalarGridSpec(
                num_scalar_prefetch=0,
                grid=(num_steps,),
                in_specs=[
                    pl.BlockSpec((tile_groups, SUBLANES, LANES), lambda i: (i, 0, 0)),
                    pl.BlockSpec((tile_groups, SUBLANES, LANES), lambda i: (i, 0, 0)),
                ],
                out_specs=pl.BlockSpec((SUBLANES, LANES), lambda i: (0, 0)),
            ),
            compiler_params=pltpu.CompilerParams(
                dimension_semantics=("arbitrary",),      # reduction axis, resident out
                vmem_limit_bytes=VMEM_LIMIT_BYTES,
            ),
        )(y3, yp3)

    total = jnp.sum(partials)

    if bulk < n:
        # Sub-group remainder (< 1024 elements): trivial plain-JAX fragment.
        total = total + jnp.sum(_xsigmoid_term(y[bulk:], yp[bulk:]))

    return total / jnp.float32(n)


if __name__ == "__main__":
    key = jax.random.PRNGKey(0)
    k1, k2, k3, k4, k5, k6 = jax.random.split(key, 6)

    def ref_loss(a, b):
        e = a - b
        return jnp.mean(2.0 * e / (1.0 + jnp.exp(-e)) - e)

    # Primary check: module-scale NCHW input (2,4,16,16) -> tiny single-block path.
    shape = (2, 4, 16, 16)
    y_t = jax.random.normal(k1, shape, dtype=jnp.float32)
    y_p = jax.random.normal(k2, shape, dtype=jnp.float32)
    loss = xsigmoid_loss(y_t, y_p)
    jax.block_until_ready(loss)
    ref = ref_loss(y_t, y_p)
    assert jnp.allclose(loss, ref, atol=1e-6, rtol=1e-5), (loss, ref)

    # Medium check: exact multiple of the group size -> pipelined path, no masking.
    shape2 = (256, 4096)
    a2 = jax.random.normal(k3, shape2, dtype=jnp.float32)
    b2 = jax.random.normal(k4, shape2, dtype=jnp.float32)
    loss2 = xsigmoid_loss(a2, b2)
    jax.block_until_ready(loss2)
    ref2 = ref_loss(a2, b2)
    assert jnp.allclose(loss2, ref2, atol=1e-5, rtol=1e-4), (loss2, ref2)

    # Larger, non-multiple size -> pipelined path with masked last tile + tiny JAX tail.
    shape3 = (3, 5, 191, 191)
    a3 = jax.random.normal(k5, shape3, dtype=jnp.float32)
    b3 = jax.random.normal(k6, shape3, dtype=jnp.float32)
    loss3 = xsigmoid_loss(a3, b3)
    jax.block_until_ready(loss3)
    ref3 = ref_loss(a3, b3)
    assert jnp.allclose(loss3, ref3, atol=1e-5, rtol=1e-4), (loss3, ref3)

    print("KERNEL_OK")
</pallas_src>

<mosaic_0001>
module attributes {stable_mosaic.version = 11 : i64} {
  func.func @_xsigmoid_single_kernel(%arg0: memref<2x8x128xf32, #tpu.memory_space<vmem>>, %arg1: memref<2x8x128xf32, #tpu.memory_space<vmem>>, %arg2: memref<8x128xf32, #tpu.memory_space<vmem>>) attributes {dimension_semantics = [], scalar_prefetch = 0 : i64, scratch_operands = 0 : i64, tpu.core_type = #tpu.core_type<tc>} {
    %c0 = arith.constant 0 : index
    %c0_0 = arith.constant 0 : index
    %c0_1 = arith.constant 0 : index
    %0 = vector.load %arg0[%c0, %c0_0, %c0_1] : memref<2x8x128xf32, #tpu.memory_space<vmem>>, vector<2x8x128xf32>
    %c0_2 = arith.constant 0 : index
    %c0_3 = arith.constant 0 : index
    %c0_4 = arith.constant 0 : index
    %1 = vector.load %arg1[%c0_2, %c0_3, %c0_4] : memref<2x8x128xf32, #tpu.memory_space<vmem>>, vector<2x8x128xf32>
    %2 = arith.subf %0, %1 : vector<2x8x128xf32>
    %cst = arith.constant 5.000000e-01 : f32
    %3 = vector.broadcast %cst : f32 to vector<2x8x128xf32>
    %4 = arith.mulf %3, %2 : vector<2x8x128xf32>
    %5 = math.tanh %4 : vector<2x8x128xf32>
    %6 = arith.mulf %2, %5 : vector<2x8x128xf32>
    %cst_5 = arith.constant dense<0.000000e+00> : vector<8x128xf32>
    %7 = vector.multi_reduction <add>, %6, %cst_5 [0] : vector<2x8x128xf32> to vector<8x128xf32>
    %c0_6 = arith.constant 0 : index
    %c0_7 = arith.constant 0 : index
    %8 = vector.load %arg2[%c0_6, %c0_7] : memref<8x128xf32, #tpu.memory_space<vmem>>, vector<8x128xf32>
    tpu.vector_store %arg2[%c0_6, %c0_7], %7 {strides = array<i32>} : memref<8x128xf32, #tpu.memory_space<vmem>>, vector<8x128xf32>,
    return
  }
}

</mosaic_0001>

<bundles_post_ra>
// kernel: xsigmoid_loss.1
= control target key start
LH: loop header
LB: loop body
LE: loop exit
PB: predicated region body
PF: predicated region fallthrough
CT: control target
= control target key end

     0   :  { %s63_s0 = inlined_call_operand.vmem [shape: f32[2,8,128], index: 0, kind: input, shape index: {}]   ;;  %s64_s1 = inlined_call_operand.vmem [shape: f32[2,8,128], index: 1, kind: input, shape index: {}]   ;;  %s65_s2 = inlined_call_operand.vmem [shape: f32[8,128], index: 2, kind: output, shape index: {}]  }
   0x1   :  { %v11_v0 = vld [vmem:[%s63_s0] sm:$0xff]  ;;  %v12_v1 = vld [vmem:[%s63_s0 + $0x8] sm:$0xff] }
   0x2   :  { %v13_v2 = vld [vmem:[%s64_s1] sm:$0xff]  ;;  %v14_v3 = vld [vmem:[%s64_s1 + $0x8] sm:$0xff] }
   0x3   :  { %v15_v4 = vsub.f32 %v11_v0, %v13_v2  ;;  %v16_v5 = vsub.f32 %v12_v1, %v14_v3 }
   0x5   :  { %v17_v6 = vmul.f32 0.5, %v15_v4  ;;  %v18_v7 = vmul.f32 0.5, %v16_v5 }
   0x7   :  { %29 = vtanh.f32 %v17_v6 }
   0x8   :  { %31 = vtanh.f32 %v18_v7 }
   0xd   :  { %v30_v8 = vpop.eup %29 }
   0xe   :  { %v32_v9 = vpop.eup %31  ;;  %v21_v10 = vmul.f32 %v30_v8, %v15_v4 }
   0xf   :  { %v22_v11 = vmul.f32 %v32_v9, %v16_v5 }
  0x11   :  { %v23_v12 = vadd.f32 %v22_v11, %v21_v10 }
  0x13   :  { %24 = vst [vmem:[%s65_s2] sm:$0xff] %v23_v12 }

</bundles_post_ra>
